<compile_context>
chip_gen: v5e
topology: v5e:2x2
jax: 0.10.0
libtpu: 0.0.40
codegen_flags: <defaults>
</compile_context>

<pallas_src>
import jax
import jax.numpy as jnp
from jax.experimental import pallas as pl
from jax.experimental.pallas import tpu as pltpu

LANES = 128
TARGET_BLOCK_BYTES = 8 << 20        # ~8 MiB per block, constant across dtypes
MULTIBLOCK_BYTES = 2 << 20          # above this, force >=2 blocks (v7x megacore)
DEFAULT_MIN_KERNEL_BYTES = 1 << 20  # below this, fused XLA elementwise is faster


def _hsigmoid_kernel(x_ref, o_ref):
    # Upcast to f32: parity with PyTorch's f32-ish semantics for low-precision
    # inputs; compute cost is irrelevant (HBM-bound, VPU/EUP nearly idle).
    x = x_ref[...].astype(jnp.float32)
    y = jnp.clip(x + 3.0, 0.0, 6.0) / 6.0
    o_ref[...] = y.astype(o_ref.dtype)


def _hsigmoid_ref(x):
    """Plain-XLA fallback / tail path (same math as the kernel)."""
    y = jnp.clip(x.astype(jnp.float32) + 3.0, 0.0, 6.0) / 6.0
    return y.astype(x.dtype)


def _sublane_unit(itemsize):
    # 8 sublanes per vreg at 32-bit; packed dtypes stack 16 (bf16) rows per vreg.
    return 8 * max(1, 4 // itemsize)


def _tile_rows(rows, itemsize):
    """Pick a row-tile: constant-byte blocks, >=2 balanced blocks for v7x."""
    sub = _sublane_unit(itemsize)
    total_bytes = rows * LANES * itemsize
    if total_bytes <= MULTIBLOCK_BYTES:
        # Single block covering the whole array (full-extent dims satisfy the
        # (8, 128) rule regardless of divisibility).
        return rows
    max_rows = max(sub, (TARGET_BLOCK_BYTES // (LANES * itemsize)) // sub * sub)
    nblocks = pl.cdiv(rows, max_rows)
    nblocks = max(nblocks, 2)
    if nblocks % 2:
        nblocks += 1                 # even block count -> balanced across 2 TCs
    tr = pl.cdiv(rows, nblocks)
    tr = max(sub, ((tr + sub - 1) // sub) * sub)
    return tr


def _hsigmoid_2d(x2d):
    rows, _ = x2d.shape
    itemsize = jnp.dtype(x2d.dtype).itemsize
    tr = _tile_rows(rows, itemsize)
    grid = (pl.cdiv(rows, tr),)      # ragged last block handled by Pallas masking

    cost = pl.CostEstimate(
        flops=3 * rows * LANES,
        transcendentals=0,
        bytes_accessed=2 * rows * LANES * itemsize,   # read + write, memory-bound
    )

    return pl.pallas_call(
        _hsigmoid_kernel,
        out_shape=jax.ShapeDtypeStruct((rows, LANES), x2d.dtype),
        grid_spec=pltpu.PrefetchScalarGridSpec(
            num_scalar_prefetch=0,
            grid=grid,
            in_specs=[pl.BlockSpec((tr, LANES), lambda i: (i, 0))],
            out_specs=pl.BlockSpec((tr, LANES), lambda i: (i, 0)),
        ),
        compiler_params=pltpu.CompilerParams(
            dimension_semantics=("parallel",),
            vmem_limit_bytes=48 << 20,   # headroom for ~32 MiB resident buffers
        ),
        cost_estimate=cost,
    )(x2d)


def hsigmoid(x, *, min_kernel_bytes=DEFAULT_MIN_KERNEL_BYTES):
    """Elementwise hard sigmoid via a Pallas TPU kernel. Accepts any shape."""
    orig_shape = x.shape
    dtype = jnp.dtype(x.dtype)
    if not jnp.issubdtype(dtype, jnp.floating):
        raise ValueError(f"hsigmoid Pallas kernel expects a floating dtype, got {dtype}")

    n = x.size
    # Small-tensor fallback: a standalone pallas_call can't fuse with neighbors
    # and carries fixed launch + unpipelined DMA cost.
    if n == 0 or n * dtype.itemsize <= min_kernel_bytes:
        return _hsigmoid_ref(x)

    flat = x.reshape(-1)              # free (contiguous row-major)
    n_aligned = (n // LANES) * LANES
    if n_aligned == 0:
        return _hsigmoid_ref(x)

    if n_aligned == n:
        # Common case (typical NCHW activations): no pad, no slice, no extra passes.
        out2d = _hsigmoid_2d(flat.reshape(n // LANES, LANES))
        return out2d.reshape(orig_shape)

    # Unaligned: kernel over the lane-aligned prefix, <=127-element tail in plain jnp.
    # TODO(synk): a ragged-lane in-kernel path could drop the remaining concat copy.
    prefix2d = flat[:n_aligned].reshape(n_aligned // LANES, LANES)
    out_prefix = _hsigmoid_2d(prefix2d).reshape(-1)
    tail = _hsigmoid_ref(flat[n_aligned:])
    return jnp.concatenate([out_prefix, tail]).reshape(orig_shape)


if __name__ == "__main__":
    key = jax.random.PRNGKey(0)
    k1, k2, k3, k4 = jax.random.split(key, 4)

    def ref_fn(x):
        return (jnp.clip(x.astype(jnp.float32) + 3.0, 0.0, 6.0) / 6.0).astype(x.dtype)

    # 1) Small lane-aligned NCHW input -- force the Pallas path (single block).
    x1 = jax.random.normal(k1, (2, 4, 16, 16), dtype=jnp.float32) * 4.0
    o1 = jax.block_until_ready(hsigmoid(x1, min_kernel_bytes=0))
    assert o1.shape == x1.shape and o1.dtype == x1.dtype
    assert jnp.allclose(o1, ref_fn(x1), atol=1e-6), "mismatch (aligned f32)"

    # 2) Non-lane-aligned shape -- aligned-prefix kernel + jnp tail.
    x2 = jax.random.normal(k2, (2, 3, 7, 5), dtype=jnp.float32) * 4.0
    o2 = jax.block_until_ready(hsigmoid(x2, min_kernel_bytes=0))
    assert o2.shape == x2.shape and o2.dtype == x2.dtype
    assert jnp.allclose(o2, ref_fn(x2), atol=1e-6), "mismatch (ragged f32)"

    # 3) bf16 -- f32 compute in-kernel, bf16 store.
    x3 = (jax.random.normal(k3, (2, 4, 16, 16), dtype=jnp.float32) * 4.0).astype(jnp.bfloat16)
    o3 = jax.block_until_ready(hsigmoid(x3, min_kernel_bytes=0))
    assert o3.shape == x3.shape and o3.dtype == jnp.bfloat16
    assert jnp.allclose(o3.astype(jnp.float32), ref_fn(x3).astype(jnp.float32), atol=1e-2)

    # 4) Larger tensor (4 MiB) on the default path -- multi-block (>=2) grid.
    x4 = jax.random.normal(k4, (4, 64, 64, 64), dtype=jnp.float32) * 4.0
    o4 = jax.block_until_ready(hsigmoid(x4))
    assert o4.shape == x4.shape
    assert jnp.allclose(o4, ref_fn(x4), atol=1e-6), "mismatch (multi-block f32)"

    # 5) Small tensor on the default path -- pure-XLA fallback.
    x5 = jax.random.normal(k1, (2, 4, 8, 8), dtype=jnp.float32)
    o5 = jax.block_until_ready(hsigmoid(x5))
    assert jnp.allclose(o5, ref_fn(x5), atol=1e-6), "mismatch (fallback)"

    print("KERNEL_OK")
</pallas_src>

<mosaic_0001>
module attributes {stable_mosaic.version = 11 : i64} {
  func.func @_hsigmoid_kernel(%arg0: i32, %arg1: memref<16x128xf32, #tpu.memory_space<vmem>>, %arg2: memref<16x128xf32, #tpu.memory_space<vmem>>) attributes {dimension_semantics = [#tpu.dimension_semantics<parallel>], iteration_bounds = array<i64: 1>, scalar_prefetch = 0 : i64, scratch_operands = 0 : i64, tpu.core_type = #tpu.core_type<tc>, window_params = [{transform_indices = @transform_0, window_bounds = array<i64: 16, 128>}, {transform_indices = @transform_1, window_bounds = array<i64: 16, 128>}]} {
    %c0 = arith.constant 0 : index
    %c0_0 = arith.constant 0 : index
    %0 = vector.load %arg1[%c0, %c0_0] : memref<16x128xf32, #tpu.memory_space<vmem>>, vector<16x128xf32>
    %cst = arith.constant 3.000000e+00 : f32
    %1 = vector.broadcast %cst : f32 to vector<16x128xf32>
    %2 = arith.addf %0, %1 : vector<16x128xf32>
    %cst_1 = arith.constant 0.000000e+00 : f32
    %cst_2 = arith.constant 6.000000e+00 : f32
    %3 = vector.broadcast %cst_1 : f32 to vector<16x128xf32>
    %4 = arith.maximumf %3, %2 : vector<16x128xf32>
    %5 = vector.broadcast %cst_2 : f32 to vector<16x128xf32>
    %6 = arith.minimumf %5, %4 : vector<16x128xf32>
    %cst_3 = arith.constant 6.000000e+00 : f32
    %7 = vector.broadcast %cst_3 : f32 to vector<16x128xf32>
    %8 = arith.divf %6, %7 : vector<16x128xf32>
    %c0_4 = arith.constant 0 : index
    %c0_5 = arith.constant 0 : index
    %9 = vector.load %arg2[%c0_4, %c0_5] : memref<16x128xf32, #tpu.memory_space<vmem>>, vector<16x128xf32>
    tpu.vector_store %arg2[%c0_4, %c0_5], %8 {strides = array<i32>} : memref<16x128xf32, #tpu.memory_space<vmem>>, vector<16x128xf32>,
    return
  }
  func.func @transform_0(%arg0: i32) -> (i32, i32) {
    %c0_i32 = arith.constant 0 : i32
    %c0_i32_0 = arith.constant 0 : i32
    return %arg0, %c0_i32 : i32, i32
  }
  func.func @transform_1(%arg0: i32) -> (i32, i32) {
    %c0_i32 = arith.constant 0 : i32
    %c0_i32_0 = arith.constant 0 : i32
    return %arg0, %c0_i32 : i32, i32
  }
}

</mosaic_0001>

<bundles_post_ra>
// kernel: tpu_custom_call.1
= control target key start
LH: loop header
LB: loop body
LE: loop exit
PB: predicated region body
PF: predicated region fallthrough
CT: control target
= control target key end

     0   :  { %6 = vsyncpa [#allocation3], 0  ;;  %s149_s0 = inlined_call_operand.hbm [shape: f32[16,128], index: 0, kind: input, shape index: {}]   ;;  %s150_s1 = inlined_call_operand.hbm [shape: f32[16,128], index: 1, kind: output, shape index: {}]  }
   0x1   :  { %7 = vsyncpa [#allocation4], 0  ;;  %s12_s8 = sshll.u32 %s149_s0, 4  ;;  %s122_s9 = smov [#allocation2]   ;;  %s13_s8 = int_to_ptr.hbm [resolvable:$true] %s12_s8 }
   0x2   :  { %s14_s10 = sshll.u32 %s122_s9, 4  ;;  %s123_s11 = smov 128   ;;  %s15_s10 = int_to_ptr.vmem [resolvable:$true] %s14_s10 }
   0x3   :  { %s124_s12 = smov 8  }
   0x4   :  { %20 = dma.hbm_to_vmem [thread:$0]  %s13_s8, 256, %s15_s10, [#allocation3], %s123_s11, %s123_s11, %s124_s12  }
   0x5   :  { %118 = dma.done.wait [#allocation3], 256  }
   0x6   :  { %119 = vsyncadd [#allocation3], 4294967040  ;;  %v125_v0 = vmov 6.0   ;;  %v25_v2 = vld [vmem:[#allocation2] sm:$0xff]  ;;  %v26_v3 = vld [vmem:[#allocation2 + $0x8] sm:$0xff]  ;;  %s126_s0 = smov [#allocation5]  }
   0x7   :  { %68 = vrcp.f32 %v125_v0  ;;  %v27_v4 = vadd.f32 3.0, %v25_v2  ;;  %v28_v6 = vadd.f32 3.0, %v26_v3  ;;  %s48_s13 = sshll.u32 %s126_s0, 4  ;;  %s50_s16 = sshll.u32 %s150_s1, 4  ;;  %s49_s13 = int_to_ptr.vmem [resolvable:$true] %s48_s13  ;;  %s51_s16 = int_to_ptr.hbm [resolvable:$true] %s50_s16 }
   0x9   :  { %v29_v7 = vmax.f32 %v27_v4, 0.0  ;;  %v30_v9 = vmax.f32 %v28_v6, 0.0 }
   0xb   :  { %v31_v11 = vmin.f32 %v29_v7, 6.0  ;;  %v32_v12 = vmin.f32 %v30_v9, 6.0 }
   0xd   :  { %v69_v1 = vpop.eup %68 }
   0xe   :  { %v34_v5 = vmul.f32 6.0, %v69_v1  ;;  %vm38_vm0 = vweird.f32 %v69_v1 }
  0x10   :  { %v35_v8 = vsub.f32 1.0, %v34_v5 }
  0x12   :  { %v36_v10 = vmul.f32 %v69_v1, %v35_v8 }
  0x14   :  { %v37_v13 = vadd.f32 %v69_v1, %v36_v10 }
  0x16   :  { %v39_v14 = vsel %vm38_vm0, %v69_v1, %v37_v13 }
  0x17   :  { %v40_v15 = vmul.f32 %v39_v14, %v31_v11  ;;  %v41_v16 = vmul.f32 %v39_v14, %v32_v12 }
  0x19   :  { %42 = vst [vmem:[#allocation5] sm:$0xff] %v40_v15 }
  0x1a   :  { %43 = vst [vmem:[#allocation5 + $0x8] sm:$0xff] %v41_v16 }
  0x1b   :  { %56 = dma.vmem_to_hbm [thread:$0]  %s49_s13, 256, %s51_s16, [#allocation4], %s123_s11, %s123_s11, %s124_s12  }
  0x1c   :  { %120 = dma.done.wait [#allocation4], 256  }
  0x1d   :  { %121 = vsyncadd [#allocation4], 4294967040 }
  0x1e   :  { %61 = vsyncpa [#allocation3], 1 }
  0x1f   :  { %62 = vsyncpa [#allocation4], 1 }

</bundles_post_ra>
